<compile_context>
chip_gen: v5e
topology: v5e:2x2
jax: 0.10.0
libtpu: 0.0.40
codegen_flags: <defaults>
</compile_context>

<pallas_src>
import jax
import jax.numpy as jnp
from jax.experimental import pallas as pl
from jax.experimental.pallas import tpu as pltpu

EPS = 1e-5


def _groupnorm_kernel(x_ref, gamma_ref, beta_ref, o_ref):
    # x_ref:     (Nb, Gb, D)  -- Nb batches, Gb groups, D = Cg*HW lanes
    # gamma_ref: (Gb, D)      -- per-channel scale, expanded along HW (resident)
    # beta_ref:  (Gb, D)      -- per-channel shift, expanded along HW (resident)
    x = x_ref[...].astype(jnp.float32)

    mean = jnp.mean(x, axis=-1, keepdims=True)          # (Nb, Gb, 1)
    xm = x - mean                                       # reused for var & xhat
    var = jnp.mean(xm * xm, axis=-1, keepdims=True)     # biased variance
    inv = jax.lax.rsqrt(var + EPS)                      # (Nb, Gb, 1)

    g = gamma_ref[...].astype(jnp.float32)[None, :, :]  # (1, Gb, D)
    b = beta_ref[...].astype(jnp.float32)[None, :, :]
    o_ref[...] = ((xm * inv) * g + b).astype(o_ref.dtype)


def _largest_divisor_at_most(n, cap):
    cap = int(max(1, min(n, cap)))
    while n % cap:
        cap -= 1
    return cap


def _pick_blocks(N, G, D, itemsize, target_bytes=4 << 20):
    """Pick (Nb, Gb) so one block is ~target_bytes, preferring full-G blocks."""
    per_group_bytes = D * itemsize
    per_batch_bytes = G * per_group_bytes
    if per_batch_bytes <= target_bytes:
        Nb = _largest_divisor_at_most(N, target_bytes // max(per_batch_bytes, 1))
        return Nb, G
    # One batch is too big: keep Nb=1 and split the group axis instead.
    Gb = _largest_divisor_at_most(G, target_bytes // max(per_group_bytes, 1))
    return 1, Gb


def group_norm_pallas(x, gamma, beta, num_groups):
    """x: (N, C, H, W); gamma, beta: (C,). Returns (N, C, H, W)."""
    N, C, H, W = x.shape
    G = num_groups
    assert C % G == 0
    Cg = C // G
    HW = H * W
    D = Cg * HW

    # Lane-dense slab per (n, g): flatten (Cg, HW) -> D.
    x_r = x.reshape(N, G, D)
    # Expand per-channel affine to per-lane (G, D); stays VMEM-resident.
    gamma_r = jnp.broadcast_to(gamma.reshape(G, Cg, 1), (G, Cg, HW)).reshape(G, D)
    beta_r = jnp.broadcast_to(beta.reshape(G, Cg, 1), (G, Cg, HW)).reshape(G, D)

    Nb, Gb = _pick_blocks(N, G, D, x.dtype.itemsize)

    out = pl.pallas_call(
        _groupnorm_kernel,
        out_shape=jax.ShapeDtypeStruct((N, G, D), x.dtype),
        grid_spec=pltpu.PrefetchScalarGridSpec(
            num_scalar_prefetch=0,
            grid=(N // Nb, G // Gb),
            in_specs=[
                pl.BlockSpec((Nb, Gb, D), lambda n, g: (n, g, 0)),
                pl.BlockSpec((Gb, D), lambda n, g: (g, 0)),   # resident gamma
                pl.BlockSpec((Gb, D), lambda n, g: (g, 0)),   # resident beta
            ],
            out_specs=pl.BlockSpec((Nb, Gb, D), lambda n, g: (n, g, 0)),
        ),
        compiler_params=pltpu.CompilerParams(
            dimension_semantics=("parallel", "parallel"),
            vmem_limit_bytes=32 << 20,   # safe on v5e/v6e/v7x; blocks capped ~4 MB
        ),
    )(x_r, gamma_r, beta_r)

    return out.reshape(N, C, H, W)


def group_norm_ref(x, gamma, beta, num_groups):
    """Plain-JAX reference (matches torch.nn.GroupNorm semantics)."""
    N, C, H, W = x.shape
    G = num_groups
    Cg = C // G
    xr = x.reshape(N, G, Cg * H * W).astype(jnp.float32)
    mean = jnp.mean(xr, axis=-1, keepdims=True)
    var = jnp.mean((xr - mean) ** 2, axis=-1, keepdims=True)
    xhat = ((xr - mean) * jax.lax.rsqrt(var + EPS)).reshape(N, C, H, W)
    return (xhat * gamma.reshape(1, C, 1, 1) + beta.reshape(1, C, 1, 1)).astype(x.dtype)


class NormalizationLayerPallas:
    """JAX/Pallas port of NormalizationLayer(num_channels)."""

    def __init__(self, num_channels):
        num_groups = min(num_channels, 32)
        assert num_channels % num_groups == 0
        self.num_groups = num_groups
        self.num_channels = num_channels
        # nn.GroupNorm default affine init: weight=1, bias=0 (deterministic).
        self.gamma = jnp.ones((num_channels,), jnp.float32)
        self.beta = jnp.zeros((num_channels,), jnp.float32)

    def __call__(self, x):
        return group_norm_pallas(x, self.gamma, self.beta, self.num_groups)


if __name__ == "__main__":
    key = jax.random.PRNGKey(0)

    # Shape 1: C=64 -> 32 groups of 2 channels, D = Cg*HW = 128 (lane-dense).
    N, C, H, W = 2, 64, 8, 8
    k0, k1, k2 = jax.random.split(key, 3)
    x = jax.random.normal(k0, (N, C, H, W), dtype=jnp.float32)
    layer = NormalizationLayerPallas(C)
    out = jax.block_until_ready(layer(x))
    ref = group_norm_ref(x, layer.gamma, layer.beta, layer.num_groups)
    assert out.shape == (N, C, H, W)
    assert jnp.allclose(out, ref, atol=1e-5, rtol=1e-5), "mismatch (shape 1)"

    # Shape 2: C=4 -> 4 groups of 1 channel, D = 256, non-trivial affine.
    N2, C2, H2, W2 = 2, 4, 16, 16
    x2 = jax.random.normal(k0, (N2, C2, H2, W2), dtype=jnp.float32)
    gamma2 = jax.random.normal(k1, (C2,), dtype=jnp.float32)
    beta2 = jax.random.normal(k2, (C2,), dtype=jnp.float32)
    out2 = jax.block_until_ready(group_norm_pallas(x2, gamma2, beta2, min(C2, 32)))
    ref2 = group_norm_ref(x2, gamma2, beta2, min(C2, 32))
    assert jnp.allclose(out2, ref2, atol=1e-5, rtol=1e-5), "mismatch (shape 2)"

    print("KERNEL_OK")
</pallas_src>

<mosaic_0001>
module attributes {stable_mosaic.version = 11 : i64} {
  func.func @_groupnorm_kernel(%arg0: i32, %arg1: i32, %arg2: memref<2x32x128xf32, #tpu.memory_space<vmem>>, %arg3: memref<32x128xf32, #tpu.memory_space<vmem>>, %arg4: memref<32x128xf32, #tpu.memory_space<vmem>>, %arg5: memref<2x32x128xf32, #tpu.memory_space<vmem>>) attributes {dimension_semantics = [#tpu.dimension_semantics<parallel>, #tpu.dimension_semantics<parallel>], iteration_bounds = array<i64: 1, 1>, scalar_prefetch = 0 : i64, scratch_operands = 0 : i64, tpu.core_type = #tpu.core_type<tc>, window_params = [{transform_indices = @transform_0, window_bounds = array<i64: 2, 32, 128>}, {transform_indices = @transform_1, window_bounds = array<i64: 32, 128>}, {transform_indices = @transform_2, window_bounds = array<i64: 32, 128>}, {transform_indices = @transform_3, window_bounds = array<i64: 2, 32, 128>}]} {
    %c0 = arith.constant 0 : index
    %c0_0 = arith.constant 0 : index
    %c0_1 = arith.constant 0 : index
    %0 = vector.load %arg2[%c0, %c0_0, %c0_1] : memref<2x32x128xf32, #tpu.memory_space<vmem>>, vector<2x32x128xf32>
    %cst = arith.constant dense<0.000000e+00> : vector<2x32xf32>
    %1 = vector.multi_reduction <add>, %0, %cst [2] : vector<2x32x128xf32> to vector<2x32xf32>
    %2 = vector.shape_cast %1 : vector<2x32xf32> to vector<2x32x1xf32>
    %cst_2 = arith.constant 1.280000e+02 : f32
    %3 = vector.broadcast %cst_2 : f32 to vector<2x32x1xf32>
    %4 = arith.divf %2, %3 : vector<2x32x1xf32>
    %5 = vector.broadcast %4 : vector<2x32x1xf32> to vector<2x32x128xf32>
    %6 = arith.subf %0, %5 : vector<2x32x128xf32>
    %7 = arith.mulf %6, %6 : vector<2x32x128xf32>
    %cst_3 = arith.constant dense<0.000000e+00> : vector<2x32xf32>
    %8 = vector.multi_reduction <add>, %7, %cst_3 [2] : vector<2x32x128xf32> to vector<2x32xf32>
    %9 = vector.shape_cast %8 : vector<2x32xf32> to vector<2x32x1xf32>
    %cst_4 = arith.constant 1.280000e+02 : f32
    %10 = vector.broadcast %cst_4 : f32 to vector<2x32x1xf32>
    %11 = arith.divf %9, %10 : vector<2x32x1xf32>
    %cst_5 = arith.constant 9.99999974E-6 : f32
    %12 = vector.broadcast %cst_5 : f32 to vector<2x32x1xf32>
    %13 = arith.addf %11, %12 : vector<2x32x1xf32>
    %14 = math.rsqrt %13 : vector<2x32x1xf32>
    %c0_6 = arith.constant 0 : index
    %c0_7 = arith.constant 0 : index
    %15 = vector.load %arg3[%c0_6, %c0_7] : memref<32x128xf32, #tpu.memory_space<vmem>>, vector<32x128xf32>
    %16 = vector.shape_cast %15 : vector<32x128xf32> to vector<1x32x128xf32>
    %c0_8 = arith.constant 0 : index
    %c0_9 = arith.constant 0 : index
    %17 = vector.load %arg4[%c0_8, %c0_9] : memref<32x128xf32, #tpu.memory_space<vmem>>, vector<32x128xf32>
    %18 = vector.shape_cast %17 : vector<32x128xf32> to vector<1x32x128xf32>
    %19 = vector.broadcast %14 : vector<2x32x1xf32> to vector<2x32x128xf32>
    %20 = arith.mulf %6, %19 : vector<2x32x128xf32>
    %21 = vector.broadcast %16 : vector<1x32x128xf32> to vector<2x32x128xf32>
    %22 = arith.mulf %20, %21 : vector<2x32x128xf32>
    %23 = vector.broadcast %18 : vector<1x32x128xf32> to vector<2x32x128xf32>
    %24 = arith.addf %22, %23 : vector<2x32x128xf32>
    %c0_10 = arith.constant 0 : index
    %c0_11 = arith.constant 0 : index
    %c0_12 = arith.constant 0 : index
    %25 = vector.load %arg5[%c0_10, %c0_11, %c0_12] : memref<2x32x128xf32, #tpu.memory_space<vmem>>, vector<2x32x128xf32>
    tpu.vector_store %arg5[%c0_10, %c0_11, %c0_12], %24 {strides = array<i32>} : memref<2x32x128xf32, #tpu.memory_space<vmem>>, vector<2x32x128xf32>,
    return
  }
  func.func @transform_0(%arg0: i32, %arg1: i32) -> (i32, i32, i32) {
    %c0_i32 = arith.constant 0 : i32
    %c0_i32_0 = arith.constant 0 : i32
    return %arg0, %arg1, %c0_i32 : i32, i32, i32
  }
  func.func @transform_1(%arg0: i32, %arg1: i32) -> (i32, i32) {
    %c0_i32 = arith.constant 0 : i32
    %c0_i32_0 = arith.constant 0 : i32
    return %arg1, %c0_i32 : i32, i32
  }
  func.func @transform_2(%arg0: i32, %arg1: i32) -> (i32, i32) {
    %c0_i32 = arith.constant 0 : i32
    %c0_i32_0 = arith.constant 0 : i32
    return %arg1, %c0_i32 : i32, i32
  }
  func.func @transform_3(%arg0: i32, %arg1: i32) -> (i32, i32, i32) {
    %c0_i32 = arith.constant 0 : i32
    %c0_i32_0 = arith.constant 0 : i32
    return %arg0, %arg1, %c0_i32 : i32, i32, i32
  }
}

</mosaic_0001>

<bundles_post_ra>
// kernel: tpu_custom_call.1
= control target key start
LH: loop header
LB: loop body
LE: loop exit
PB: predicated region body
PF: predicated region fallthrough
CT: control target
= control target key end

     0   :  { %8 = vsyncpa [#allocation3], 0  ;;  %s592_s0 = inlined_call_operand.hbm [shape: f32[2,32,128], index: 0, kind: input, shape index: {}]   ;;  %s593_s1 = inlined_call_operand.hbm [shape: f32[32,128], index: 1, kind: input, shape index: {}]   ;;  %s594_s2 = inlined_call_operand.hbm [shape: f32[32,128], index: 2, kind: input, shape index: {}]   ;;  %s595_s3 = inlined_call_operand.hbm [shape: f32[2,32,128], index: 3, kind: output, shape index: {}]  }
   0x1   :  { %9 = vsyncpa [#allocation6], 0 }
   0x2   :  { %10 = vsyncpa [#allocation4], 0  ;;  %s28_s14 = sshll.u32 %s593_s1, 4  ;;  %s416_s15 = smov [#allocation5]   ;;  %s29_s14 = int_to_ptr.hbm [resolvable:$true] %s28_s14 }
   0x3   :  { %s30_s16 = sshll.u32 %s416_s15, 4  ;;  %s15_s19 = sshll.u32 %s592_s0, 4  ;;  %s31_s16 = int_to_ptr.vmem [resolvable:$true] %s30_s16  ;;  %s16_s19 = int_to_ptr.hbm [resolvable:$true] %s15_s19 }
   0x4   :  { %s417_s20 = smov 128   ;;  %s418_s21 = smov 8  }
   0x5   :  { %36 = dma.hbm_to_vmem [thread:$0]  %s29_s14, 512, %s31_s16, [#allocation6], %s417_s20, %s417_s20, %s418_s21  }
   0x6   :  { %s419_s22 = smov [#allocation2]   ;;  %s41_s1 = sshll.u32 %s594_s2, 4  ;;  %s42_s1 = int_to_ptr.hbm [resolvable:$true] %s41_s1 }
   0x7   :  { %s17_s23 = sshll.u32 %s419_s22, 4  ;;  %s420_s0 = smov [#allocation7]   ;;  %s18_s23 = int_to_ptr.vmem [resolvable:$true] %s17_s23 }
   0x8   :  { %23 = dma.hbm_to_vmem [thread:$0]  %s16_s19, 1024, %s18_s23, [#allocation3], %s417_s20, %s417_s20, %s418_s21  }
   0x9   :  { %s43_s26 = sshll.u32 %s420_s0, 4  ;;  %s44_s26 = int_to_ptr.vmem [resolvable:$true] %s43_s26 }
   0xa   :  { %49 = dma.hbm_to_vmem [thread:$0]  %s42_s1, 512, %s44_s26, [#allocation6], %s417_s20, %s417_s20, %s418_s21  }
   0xb   :  { %410 = dma.done.wait [#allocation3], 1024  }
   0xc   :  { %411 = vsyncadd [#allocation3], 4294966272 }
   0xd   :  { %412 = dma.done.wait [#allocation6], 1024  }
   0xe   :  { %413 = vsyncadd [#allocation6], 4294966272  ;;  %v66_v0 = vld [vmem:[#allocation2 + $0x20] sm:$0xff]  ;;  %v64_v1 = vld [vmem:[#allocation2 + $0x10] sm:$0xff]  ;;  %v421_v8 = vmov 128.0   ;;  %s422_s2 = smov [#allocation8]  }
   0xf   :  { %v62_v2 = vld [vmem:[#allocation2] sm:$0xff]  ;;  %78 = vadd.xlane.f32.xlu2 %v66_v0  ;;  %74 = vadd.xlane.f32.xlu1 %v64_v1  ;;  %v67_v3 = vld [vmem:[#allocation2 + $0x28] sm:$0xff]  ;;  %v65_v4 = vld [vmem:[#allocation2 + $0x18] sm:$0xff]  ;;  %296 = vrcp.f32 %v421_v8  ;;  %s273_s27 = sshll.u32 %s422_s2, 4  ;;  %s275_s30 = sshll.u32 %s595_s3, 4  ;;  %s274_s27 = int_to_ptr.vmem [resolvable:$true] %s273_s27  ;;  %s276_s30 = int_to_ptr.hbm [resolvable:$true] %s275_s30 }
  0x10   :  { %70 = vadd.xlane.f32.xlu0 %v62_v2  ;;  %v63_v5 = vld [vmem:[#allocation2 + $0x8] sm:$0xff]  ;;  %v69_v6 = vld [vmem:[#allocation2 + $0x38] sm:$0xff]  ;;  %v68_v7 = vld [vmem:[#allocation2 + $0x30] sm:$0xff] }
  0x15   :  { %v297_v9 = vpop.eup %296 }
  0x16   :  { %v87_v10 = vmul.f32 128.0, %v297_v9  ;;  %vm91_vm0 = vweird.f32 %v297_v9 }
  0x17   :  { %80 = vadd.xlane.f32.xlu2 %v67_v3  ;;  %76 = vadd.xlane.f32.xlu1 %v65_v4 }
  0x18   :  { %72 = vadd.xlane.f32.xlu0 %v63_v5  ;;  %v88_v11 = vsub.f32 1.0, %v87_v10 }
  0x1a   :  { %v89_v12 = vmul.f32 %v297_v9, %v88_v11 }
  0x1c   :  { %v90_v13 = vadd.f32 %v297_v9, %v89_v12 }
  0x1e   :  { %v461_v14 = vsel %vm91_vm0, %v297_v9, %v90_v13 }
  0x1f   :  { %84 = vadd.xlane.f32.xlu1 %v69_v6 }
  0x20   :  { %82 = vadd.xlane.f32.xlu0 %v68_v7 }
  0x82   :  { %v79_v15 = vpop.xlane.xlu2 %78  ;;  %v75_v16 = vpop.xlane.xlu1 %74 }
  0x83   :  { %v95_v17 = vmul.f32 %v461_v14, %v75_v16  ;;  %v71_v18 = vpop.xlane.xlu0 %70  ;;  %v97_v32 = vmul.f32 %v461_v14, %v79_v15 }
  0x84   :  { %v93_v19 = vmul.f32 %v461_v14, %v71_v18 }
  0x85   :  { %v465_v20 = vsub.f32 %v64_v1, %v95_v17  ;;  %v489_v37 = vsub.f32 %v66_v0, %v97_v32 }
  0x86   :  { %v467_v21 = vsub.f32 %v62_v2, %v93_v19 }
  0x87   :  { %v111_v22 = vmul.f32 %v465_v20, %v465_v20  ;;  %v113_v42 = vmul.f32 %v489_v37, %v489_v37 }
  0x88   :  { %v109_v23 = vmul.f32 %v467_v21, %v467_v21 }
  0x89   :  { %121 = vadd.xlane.f32.xlu1 %v111_v22 }
  0x8a   :  { %117 = vadd.xlane.f32.xlu2 %v109_v23  ;;  %v81_v24 = vpop.xlane.xlu2 %80  ;;  %v77_v25 = vpop.xlane.xlu1 %76 }
  0x8b   :  { %v98_v26 = vmul.f32 %v461_v14, %v81_v24  ;;  %v96_v27 = vmul.f32 %v461_v14, %v77_v25  ;;  %v73_v28 = vpop.xlane.xlu0 %72  ;;  %v527_v24 = vld [vmem:[#allocation5 + $0x10] sm:$0xff] }
  0x8c   :  { %v94_v29 = vmul.f32 %v461_v14, %v73_v28 }
  0x8d   :  { %v476_v30 = vsub.f32 %v67_v3, %v98_v26  ;;  %v478_v31 = vsub.f32 %v65_v4, %v96_v27 }
  0x8e   :  { %v481_v33 = vsub.f32 %v63_v5, %v94_v29  ;;  %v532_v29 = vld [vmem:[#allocation5] sm:$0xff] }
  0x8f   :  { %v114_v34 = vmul.f32 %v476_v30, %v476_v30  ;;  %v112_v35 = vmul.f32 %v478_v31, %v478_v31 }
  0x90   :  { %v110_v36 = vmul.f32 %v481_v33, %v481_v33 }
  0x91   :  { %127 = vadd.xlane.f32.xlu1 %v114_v34 }
  0x92   :  { %123 = vadd.xlane.f32.xlu2 %v112_v35  ;;  %119 = vadd.xlane.f32.xlu0 %v110_v36  ;;  %v85_v39 = vpop.xlane.xlu1 %84  ;;  %v536_v35 = vld [vmem:[#allocation7 + $0x10] sm:$0xff] }
  0x93   :  { %v83_v38 = vpop.xlane.xlu0 %82  ;;  %v100_v43 = vmul.f32 %v461_v14, %v85_v39 }
  0x94   :  { %v99_v40 = vmul.f32 %v461_v14, %v83_v38 }
  0x95   :  { %v499_v45 = vsub.f32 %v69_v6, %v100_v43 }
  0x96   :  { %v492_v41 = vsub.f32 %v68_v7, %v99_v40 }
  0x97   :  { %v116_v46 = vmul.f32 %v499_v45, %v499_v45 }
  0x98   :  { %v115_v44 = vmul.f32 %v492_v41, %v492_v41 }
  0x9a   :  { %125 = vadd.xlane.f32.xlu0 %v113_v42  ;;  %129 = vadd.xlane.f32.xlu2 %v115_v44  ;;  %v541_v42 = vld [vmem:[#allocation7] sm:$0xff] }
  0xa2   :  { %131 = vadd.xlane.f32.xlu0 %v116_v46 }
  0xfc   :  { %v122_v47 = vpop.xlane.xlu1 %121 }
  0xfd   :  { %v135_v48 = vmul.f32 %v122_v47, %v461_v14  ;;  %v118_v49 = vpop.xlane.xlu2 %117 }
  0xfe   :  { %v133_v50 = vmul.f32 %v118_v49, %v461_v14 }
  0xff   :  { %v143_v51 = vadd.f32 1e-05, %v135_v48 }
 0x100   :  { %v141_v52 = vadd.f32 1e-05, %v133_v50 }
 0x101   :  { %298 = vrsqrt.f32 %v143_v51  ;;  %vm175_vm1 = vweird.f32 %v143_v51 }
 0x102   :  { %300 = vrsqrt.f32 %v141_v52  ;;  %vm155_vm5 = vweird.f32 %v141_v52 }
 0x104   :  { %v128_v53 = vpop.xlane.xlu1 %127 }
 0x105   :  { %v138_v54 = vmul.f32 %v128_v53, %v461_v14  ;;  %v124_v55 = vpop.xlane.xlu2 %123  ;;  %v120_v56 = vpop.xlane.xlu0 %119 }
 0x106   :  { %v136_v57 = vmul.f32 %v124_v55, %v461_v14  ;;  %v134_v58 = vmul.f32 %v120_v56, %v461_v14  ;;  %v230_v56 = vld [vmem:[#allocation5 + $0x8] sm:$0xff] }
 0x107   :  { %v299_v59 = vpop.eup %298  ;;  %v146_v60 = vadd.f32 1e-05, %v138_v54 }
 0x108   :  { %v301_v61 = vpop.eup %300  ;;  %v170_v62 = vmul.f32 %v299_v59, %v143_v51  ;;  %v508_v63 = vadd.f32 1e-05, %v136_v57  ;;  %v510_v0 = vadd.f32 1e-05, %v134_v58  ;;  %vm176_vm2 = vweird.f32 %v299_v59 }
 0x109   :  { %v150_v1 = vmul.f32 %v301_v61, %v141_v52  ;;  %302 = vrsqrt.f32 %v146_v60  ;;  %vm156_vm3 = vweird.f32 %v301_v61  ;;  %vm177_vm4 = vmor %vm175_vm1, %vm176_vm2  ;;  %vm205_vm7 = vweird.f32 %v146_v60 }
 0x10a   :  { %v171_v2 = vmul.f32 %v299_v59, %v170_v62  ;;  %304 = vrsqrt.f32 %v508_v63  ;;  %vm157_vm6 = vmor %vm155_vm5, %vm156_vm3  ;;  %vm185_vm9 = vweird.f32 %v508_v63  ;;  %vm165_vm14 = vweird.f32 %v510_v0  ;;  %v232_v62 = vld [vmem:[#allocation5 + $0x18] sm:$0xff] }
 0x10b   :  { %v151_v3 = vmul.f32 %v301_v61, %v150_v1  ;;  %306 = vrsqrt.f32 %v510_v0 }
 0x10c   :  { %v172_v4 = vmul.f32 0.5, %v171_v2  ;;  %v234_v2 = vld [vmem:[#allocation7 + $0x8] sm:$0xff] }
 0x10d   :  { %v152_v5 = vmul.f32 0.5, %v151_v3  ;;  %v130_v6 = vpop.xlane.xlu2 %129  ;;  %v126_v7 = vpop.xlane.xlu0 %125 }
 0x10e   :  { %v173_v8 = vsub.f32 1.5, %v172_v4  ;;  %v139_v9 = vmul.f32 %v130_v6, %v461_v14  ;;  %v137_v10 = vmul.f32 %v126_v7, %v461_v14  ;;  %v236_v6 = vld [vmem:[#allocation7 + $0x18] sm:$0xff] }
 0x10f   :  { %v303_v11 = vpop.eup %302  ;;  %v153_v12 = vsub.f32 1.5, %v152_v5 }
 0x110   :  { %v516_v13 = vpop.eup %304  ;;  %v174_v15 = vmul.f32 %v299_v59, %v173_v8  ;;  %v200_v16 = vmul.f32 %v303_v11, %v146_v60  ;;  %v518_v17 = vadd.f32 1e-05, %v139_v9  ;;  %v525_v23 = vadd.f32 1e-05, %v137_v10 }
 0x111   :  { %v520_v18 = vpop.eup %306  ;;  %v154_v19 = vmul.f32 %v301_v61, %v153_v12  ;;  %v180_v22 = vmul.f32 %v516_v13, %v508_v63  ;;  %vm206_vm8 = vweird.f32 %v303_v11  ;;  %vm186_vm11 = vweird.f32 %v516_v13 }
 0x112   :  { %v178_v25 = vsel %vm177_vm4, %v299_v59, %v174_v15  ;;  %v201_v26 = vmul.f32 %v303_v11, %v200_v16  ;;  %v160_v27 = vmul.f32 %v520_v18, %v510_v0  ;;  %308 = vrsqrt.f32 %v518_v17  ;;  %vm549_vm10 = vmor %vm205_vm7, %vm206_vm8 }
 0x113   :  { %v239_v28 = vmul.f32 %v178_v25, %v465_v20  ;;  %v158_v32 = vsel %vm157_vm6, %v301_v61, %v154_v19  ;;  %v181_v34 = vmul.f32 %v516_v13, %v180_v22  ;;  %310 = vrsqrt.f32 %v525_v23  ;;  %vm187_vm13 = vmor %vm185_vm9, %vm186_vm11 }
 0x114   :  { %v237_v36 = vmul.f32 %v158_v32, %v467_v21  ;;  %v202_v38 = vmul.f32 0.5, %v201_v26  ;;  %v161_v39 = vmul.f32 %v520_v18, %v160_v27  ;;  %vm166_vm12 = vweird.f32 %v520_v18 }
 0x115   :  { %v247_v40 = vmul.f32 %v239_v28, %v527_v24  ;;  %v182_v20 = vmul.f32 0.5, %v181_v34  ;;  %v132_v43 = vpop.xlane.xlu0 %131  ;;  %vm167_vm15 = vmor %vm165_vm14, %vm166_vm12  ;;  %vm215_vm0 = vweird.f32 %v518_v17  ;;  %vm195_vm4 = vweird.f32 %v525_v23 }
 0x116   :  { %v245_v44 = vmul.f32 %v237_v36, %v532_v29  ;;  %v203_v46 = vsub.f32 1.5, %v202_v38  ;;  %v162_v47 = vmul.f32 0.5, %v161_v39  ;;  %v140_v21 = vmul.f32 %v132_v43, %v461_v14 }
 0x117   :  { %v255_v48 = vadd.f32 %v247_v40, %v536_v35  ;;  %v183_v50 = vsub.f32 1.5, %v182_v20 }
 0x118   :  { %v253_v51 = vadd.f32 %v245_v44, %v541_v42  ;;  %v204_v52 = vmul.f32 %v303_v11, %v203_v46  ;;  %v163_v53 = vsub.f32 1.5, %v162_v47  ;;  %v556_v54 = vadd.f32 1e-05, %v140_v21  ;;  %v309_v55 = vpop.eup %308 }
 0x119   :  { %263 = vst [vmem:[#allocation8 + $0x10] sm:$0xff] %v255_v48  ;;  %v184_v14 = vmul.f32 %v516_v13, %v183_v50  ;;  %v210_v59 = vmul.f32 %v309_v55, %v518_v17  ;;  %v311_v60 = vpop.eup %310  ;;  %vm216_vm1 = vweird.f32 %v309_v55 }
 0x11a   :  { %261 = vst [vmem:[#allocation8] sm:$0xff] %v253_v51  ;;  %v208_v57 = vsel %vm549_vm10, %v303_v11, %v204_v52  ;;  %v164_v58 = vmul.f32 %v520_v18, %v163_v53  ;;  %312 = vrsqrt.f32 %v556_v54  ;;  %v190_v0 = vmul.f32 %v311_v60, %v525_v23  ;;  %vm217_vm3 = vmor %vm215_vm0, %vm216_vm1 }
 0x11b   :  { %v242_v61 = vmul.f32 %v208_v57, %v476_v30  ;;  %v188_v1 = vsel %vm187_vm13, %v516_v13, %v184_v14  ;;  %v211_v4 = vmul.f32 %v309_v55, %v210_v59  ;;  %vm196_vm2 = vweird.f32 %v311_v60 }
 0x11c   :  { %v240_v63 = vmul.f32 %v188_v1, %v478_v31  ;;  %v168_v3 = vsel %vm167_vm15, %v520_v18, %v164_v58  ;;  %v191_v9 = vmul.f32 %v311_v60, %v190_v0  ;;  %vm197_vm5 = vmor %vm195_vm4, %vm196_vm2  ;;  %vm225_vm7 = vweird.f32 %v556_v54 }
 0x11d   :  { %v250_v5 = vmul.f32 %v242_v61, %v230_v56  ;;  %v238_v30 = vmul.f32 %v168_v3, %v481_v33  ;;  %v212_v8 = vmul.f32 0.5, %v211_v4 }
 0x11e   :  { %v248_v7 = vmul.f32 %v240_v63, %v232_v62  ;;  %v192_v31 = vmul.f32 0.5, %v191_v9 }
 0x11f   :  { %v258_v10 = vadd.f32 %v250_v5, %v234_v2  ;;  %v246_v11 = vmul.f32 %v238_v30, %v230_v56  ;;  %v213_v13 = vsub.f32 1.5, %v212_v8 }
 0x120   :  { %v256_v12 = vadd.f32 %v248_v7, %v236_v6  ;;  %v313_v15 = vpop.eup %312  ;;  %v193_v19 = vsub.f32 1.5, %v192_v31 }
 0x121   :  { %266 = vst [vmem:[#allocation8 + $0x28] sm:$0xff] %v258_v10  ;;  %v254_v16 = vadd.f32 %v246_v11, %v234_v2  ;;  %v214_v18 = vmul.f32 %v309_v55, %v213_v13  ;;  %v220_v33 = vmul.f32 %v313_v15, %v556_v54  ;;  %vm226_vm6 = vweird.f32 %v313_v15 }
 0x122   :  { %264 = vst [vmem:[#allocation8 + $0x18] sm:$0xff] %v256_v12  ;;  %v194_v25 = vmul.f32 %v311_v60, %v193_v19  ;;  %vm227_vm8 = vmor %vm225_vm7, %vm226_vm6 }
 0x123   :  { %262 = vst [vmem:[#allocation8 + $0x8] sm:$0xff] %v254_v16  ;;  %v218_v22 = vsel %vm217_vm3, %v309_v55, %v214_v18  ;;  %v221_v17 = vmul.f32 %v313_v15, %v220_v33 }
 0x124   :  { %v243_v26 = vmul.f32 %v218_v22, %v492_v41  ;;  %v198_v27 = vsel %vm197_vm5, %v311_v60, %v194_v25 }
 0x125   :  { %v222_v28 = vmul.f32 0.5, %v221_v17  ;;  %v241_v34 = vmul.f32 %v198_v27, %v489_v37 }
 0x126   :  { %v251_v32 = vmul.f32 %v243_v26, %v527_v24 }
 0x127   :  { %v223_v36 = vsub.f32 1.5, %v222_v28  ;;  %v249_v39 = vmul.f32 %v241_v34, %v532_v29 }
 0x128   :  { %v259_v38 = vadd.f32 %v251_v32, %v536_v35 }
 0x129   :  { %v224_v40 = vmul.f32 %v313_v15, %v223_v36  ;;  %v257_v23 = vadd.f32 %v249_v39, %v541_v42 }
 0x12a   :  { %267 = vst [vmem:[#allocation8 + $0x30] sm:$0xff] %v259_v38 }
 0x12b   :  { %v228_v41 = vsel %vm227_vm8, %v313_v15, %v224_v40  ;;  %265 = vst [vmem:[#allocation8 + $0x20] sm:$0xff] %v257_v23 }
 0x12c   :  { %v244_v20 = vmul.f32 %v228_v41, %v499_v45 }
 0x12e   :  { %v252_v37 = vmul.f32 %v244_v20, %v232_v62 }
 0x130   :  { %v260_v24 = vadd.f32 %v252_v37, %v236_v6 }
 0x132   :  { %268 = vst [vmem:[#allocation8 + $0x38] sm:$0xff] %v260_v24 }
 0x133   :  { %281 = dma.vmem_to_hbm [thread:$0]  %s274_s27, 1024, %s276_s30, [#allocation4], %s417_s20, %s417_s20, %s418_s21  }
 0x134   :  { %414 = dma.done.wait [#allocation4], 1024  }
 0x135   :  { %415 = vsyncadd [#allocation4], 4294966272 }
 0x136   :  { %286 = vsyncpa [#allocation3], 1 }
 0x137   :  { %287 = vsyncpa [#allocation6], 1 }
 0x138   :  { %288 = vsyncpa [#allocation4], 1 }

</bundles_post_ra>
